<compile_context>
chip_gen: v6e
topology: v6e:2x2x1
jax: 0.10.0
libtpu: 0.0.40
codegen_flags: <defaults>
</compile_context>

<pallas_src>
from typing import Optional

import jax
import jax.numpy as jnp
from jax import lax
from jax.experimental import pallas as pl
from jax.experimental.pallas import tpu as pltpu

LANE = 128
SUBLANE = 8
_DEFAULT_PHYS_VMEM = 64 * 1024 * 1024   # v7x per-TensorCore VMEM (most conservative)


def _round_up(x: int, m: int) -> int:
    return (x + m - 1) // m * m


def _physical_vmem_bytes() -> int:
    """Generation-aware VMEM size (128 MiB on v5e/v6e, 64 MiB per TC on v7x)."""
    try:
        info = pltpu.get_tpu_info()
        for name in ("vmem_capacity_bytes", "vmem_size_bytes", "vmem_bytes"):
            v = getattr(info, name, None)
            if v:
                return int(v)
    except Exception:
        pass
    return _DEFAULT_PHYS_VMEM


def _row_align(dtype) -> int:
    """Native sublane tile rows for a dtype: 8 for f32, 16 for bf16, 32 for int8."""
    return max(SUBLANE, (4 * SUBLANE) // jnp.dtype(dtype).itemsize)


def _choose_tm(batch: int, max_tm: int, row_align: int) -> int:
    """Batch tile: multiple of row_align, <= max_tm, and >= 2 grid programs whenever the
    batch spans more than one sublane tile (keeps both v7x TCs busy + enables pipelining)."""
    b_al = _round_up(batch, row_align)
    tm = min(max_tm, b_al)
    if b_al > row_align and b_al // tm < 2:
        tm = max(row_align, _round_up((b_al + 1) // 2, row_align))
    return tm


def _apply_activation(y, name):
    if name is None:
        return y
    if name == "relu":
        return jnp.maximum(y, 0.0)
    if name == "tanh":
        return jnp.tanh(y)
    if name == "sigmoid":
        return jax.nn.sigmoid(y)
    if name == "gelu":
        return jax.nn.gelu(y)
    raise ValueError(f"unsupported activation: {name}")


def _layer_epilogue(y, b, g, beta, cfg):
    """f32 epilogue: bias [+ LayerNorm] [+ activation].

    Padded output lanes of `y` are exactly zero (padded weight columns and padded bias are
    zero), so no pre-mean mask is needed; only the post-centering mask for the variance.
    """
    y = y + b
    if cfg["layer_norm"]:
        n_real = cfg["n_out"]
        mean = jnp.sum(y, axis=-1, keepdims=True) * (1.0 / n_real)
        cent = y - mean
        if cfg["n_out_p"] != n_real:
            lane = lax.broadcasted_iota(jnp.int32, y.shape, 1)
            cent = jnp.where(lane < n_real, cent, 0.0)
        var = jnp.sum(cent * cent, axis=-1, keepdims=True) * (1.0 / n_real)
        y = cent * lax.rsqrt(var + 1e-5)
        y = y * g + beta  # padded gamma/beta are 0 -> padded lanes stay 0
    return _apply_activation(y, cfg["activation"])


# ------------------------------ fused all-layers kernel ------------------------------

def _make_fused_kernel(layer_cfgs, compute_dtype):
    n_layers = len(layer_cfgs)

    def kernel(x_ref, *refs):
        o_ref = refs[-1]
        prefs = refs[:-1]
        h = x_ref[...]                                   # already compute_dtype
        p = 0
        for li, cfg in enumerate(layer_cfgs):
            w_ref, b_ref = prefs[p], prefs[p + 1]
            p += 2
            if cfg["layer_norm"]:
                g, beta = prefs[p][...], prefs[p + 1][...]
                p += 2
            else:
                g = beta = None
            y = jnp.dot(h, w_ref[...], preferred_element_type=jnp.float32)
            y = _layer_epilogue(y, b_ref[...], g, beta, cfg)     # f32
            # single cast per layer when feeding the next matmul; final layer stays f32
            h = y if li == n_layers - 1 else y.astype(compute_dtype)
        o_ref[...] = h.astype(o_ref.dtype)

    return kernel


def _fused_forward(x_p, flat_params, layer_cfgs, compute_dtype, tm, out_dtype, vmem_limit):
    b_p = x_p.shape[0]
    in_p = layer_cfgs[0]["n_in_p"]
    out_p = layer_cfgs[-1]["n_out_p"]

    # Weights / bias / gamma / beta are fully VMEM-resident and single-buffered:
    # whole-array VMEM windows (no per-step DMA, no 2x double-buffer VMEM cost).
    resident = pl.BlockSpec(memory_space=pltpu.MemorySpace.VMEM)
    in_specs = [pl.BlockSpec((tm, in_p), lambda i: (i, 0))]
    in_specs += [resident] * len(flat_params)

    return pl.pallas_call(
        _make_fused_kernel(layer_cfgs, compute_dtype),
        out_shape=jax.ShapeDtypeStruct((b_p, out_p), out_dtype),
        grid=(b_p // tm,),
        in_specs=in_specs,
        out_specs=pl.BlockSpec((tm, out_p), lambda i: (i, 0)),
        compiler_params=pltpu.CompilerParams(
            dimension_semantics=("parallel",),
            vmem_limit_bytes=vmem_limit),
    )(x_p, *flat_params)


# --------------------------- tiled per-layer fallback kernel ---------------------------

def _make_tiled_layer_kernel(cfg):
    def kernel(*refs):
        if cfg["layer_norm"]:
            x_ref, w_ref, b_ref, g_ref, beta_ref, o_ref, acc_ref = refs
        else:
            x_ref, w_ref, b_ref, o_ref, acc_ref = refs
            g_ref = beta_ref = None
        k = pl.program_id(1)

        @pl.when(k == 0)
        def _():
            acc_ref[...] = jnp.zeros_like(acc_ref)

        acc_ref[...] += jnp.dot(x_ref[...], w_ref[...],
                                preferred_element_type=jnp.float32)

        @pl.when(k == pl.num_programs(1) - 1)
        def _():
            g = g_ref[...] if cfg["layer_norm"] else None
            beta = beta_ref[...] if cfg["layer_norm"] else None
            y = _layer_epilogue(acc_ref[...], b_ref[...], g, beta, cfg)
            o_ref[...] = y.astype(o_ref.dtype)

    return kernel


def _tiled_layer_forward(h_p, layer_params, cfg, compute_dtype, tm, out_dtype, vmem_limit):
    b_p = h_p.shape[0]
    in_p, out_p = cfg["n_in_p"], cfg["n_out_p"]
    cbytes = jnp.dtype(compute_dtype).itemsize
    obytes = jnp.dtype(out_dtype).itemsize

    # Largest K tile whose double-buffered x/w/out blocks + f32 accumulator fit VMEM.
    tk = 128
    for cand in (in_p, 2048, 1024, 512, 256, 128):
        if cand > in_p or in_p % cand:
            continue
        est = (2 * tm * cand * cbytes          # x blocks (double buffered)
               + 2 * cand * out_p * cbytes     # weight blocks (double buffered)
               + 2 * tm * out_p * obytes       # output blocks
               + tm * out_p * 4                # f32 accumulator scratch
               + 8 * out_p * 4)                # bias / gamma / beta
        if est <= vmem_limit:
            tk = cand
            break

    in_specs = [pl.BlockSpec((tm, tk), lambda i, k: (i, k)),
                pl.BlockSpec((tk, out_p), lambda i, k: (k, 0)),
                pl.BlockSpec((1, out_p), lambda i, k: (0, 0))]
    if cfg["layer_norm"]:
        in_specs += [pl.BlockSpec((1, out_p), lambda i, k: (0, 0)),
                     pl.BlockSpec((1, out_p), lambda i, k: (0, 0))]

    # TODO(synk): if profiling shows the weight DMA exposed for tiny k trip counts, bump the
    # weight BlockSpec to pipeline_mode=pl.Buffered(3) where VMEM headroom allows.
    return pl.pallas_call(
        _make_tiled_layer_kernel(cfg),
        out_shape=jax.ShapeDtypeStruct((b_p, out_p), out_dtype),
        grid=(b_p // tm, in_p // tk),
        in_specs=in_specs,
        out_specs=pl.BlockSpec((tm, out_p), lambda i, k: (i, 0)),
        scratch_shapes=[pltpu.VMEM((tm, out_p), jnp.float32)],
        compiler_params=pltpu.CompilerParams(
            dimension_semantics=("parallel", "arbitrary"),
            vmem_limit_bytes=vmem_limit),
    )(h_p, *layer_params)


# ------------------------------------- module -------------------------------------

class FeedForwardPallas:
    """JAX/Pallas re-implementation of the PyTorch FeedForward module (inference)."""

    def __init__(self, num_inputs: int, num_outputs: int, num_hidden: int, num_layers: int,
                 dropout: float, activation: str, activation_last: Optional[str] = None,
                 dropout_last: bool = False, layer_norm: bool = False, *, key,
                 compute_dtype=jnp.bfloat16, output_dtype=jnp.float32,
                 force_tiled: bool = False):
        self.num_layers = num_layers
        self.num_outputs = num_outputs
        self.activation = activation
        self.activation_last = activation_last
        self.layer_norm = layer_norm
        self.compute_dtype = compute_dtype
        self.output_dtype = output_dtype
        # dropout / dropout_last are identity at inference time.

        # Generation-aware VMEM budget (128 MiB v5e/v6e, 64 MiB v7x; conservative fallback).
        self._phys_vmem = _physical_vmem_bytes()
        self._vmem_limit = (self._phys_vmem * 3) // 4     # 96 MiB v5e/v6e, 48 MiB v7x

        in_sizes = [num_inputs] + [num_hidden] * (num_layers - 1)
        out_sizes = [num_hidden] * (num_layers - 1) + [num_outputs]

        self.layer_cfgs = []
        self.ref_params = []     # unpadded f32 (PyTorch-layout) params for reference math
        self.layer_params = []   # padded, pre-transposed kernel params (per layer)
        for idx, (ni, no) in enumerate(zip(in_sizes, out_sizes)):
            is_last = idx == num_layers - 1
            act = activation_last if is_last else activation
            ln = layer_norm and not is_last
            nip, nop = _round_up(ni, LANE), _round_up(no, LANE)
            self.layer_cfgs.append(dict(n_in=ni, n_out=no, n_in_p=nip, n_out_p=nop,
                                        layer_norm=ln, activation=act))

            key, kw, kb = jax.random.split(key, 3)
            bound = 1.0 / (ni ** 0.5)  # torch nn.Linear default init range
            w = jax.random.uniform(kw, (no, ni), jnp.float32, -bound, bound)
            b = jax.random.uniform(kb, (no,), jnp.float32, -bound, bound)
            gamma = jnp.ones((no,), jnp.float32)   # nn.LayerNorm default weight
            beta = jnp.zeros((no,), jnp.float32)   # nn.LayerNorm default bias
            self.ref_params.append((w, b, gamma, beta))

            # padded, pre-transposed weight [in_p, out_p] in compute dtype; f32 epilogue params
            wt_p = jnp.zeros((nip, nop), jnp.float32).at[:ni, :no].set(w.T).astype(compute_dtype)
            b_p = jnp.zeros((1, nop), jnp.float32).at[:, :no].set(b)
            lp = [wt_p, b_p]
            if ln:
                lp.append(jnp.zeros((1, nop), jnp.float32).at[:, :no].set(gamma))
                lp.append(jnp.zeros((1, nop), jnp.float32).at[:, :no].set(beta))
            self.layer_params.append(lp)

        # Fused-path VMEM estimate: single-buffered resident params + double-buffered x/out
        # blocks + headroom for live f32 activations / spills (tm_est rows).
        cbytes = jnp.dtype(compute_dtype).itemsize
        resident_bytes = sum(int(p.size) * p.dtype.itemsize
                             for lp in self.layer_params for p in lp)
        max_p = max(max(c["n_in_p"], c["n_out_p"]) for c in self.layer_cfgs)
        tm_est = 128
        est = (resident_bytes
               + 2 * tm_est * self.layer_cfgs[0]["n_in_p"] * cbytes
               + 2 * tm_est * self.layer_cfgs[-1]["n_out_p"] * jnp.dtype(output_dtype).itemsize
               + 4 * tm_est * max_p * 4)
        self.use_fused = (not force_tiled) and est <= self._vmem_limit

        self._forward = jax.jit(self._forward_impl)

    def _forward_impl(self, x, layer_params):
        batch, n_in = x.shape
        cfgs = self.layer_cfgs
        in_p = cfgs[0]["n_in_p"]
        cdt = self.compute_dtype
        cbytes = jnp.dtype(cdt).itemsize
        ralign = _row_align(cdt)

        if self.use_fused:
            tm = _choose_tm(batch, 128, ralign)
        else:
            tm = _choose_tm(batch, 256, ralign)
            max_out_p = max(c["n_out_p"] for c in cfgs)
            # shrink tm until even a minimal (tk=128) tiled layer fits the VMEM limit
            while tm > ralign and (2 * tm * 128 * cbytes + 2 * 128 * max_out_p * cbytes
                                   + 3 * tm * max_out_p * 4
                                   + 8 * max_out_p * 4) > self._vmem_limit:
                tm = max(ralign, _round_up(tm // 2, ralign))

        b_p = _round_up(batch, tm)

        # pad + cast once in the wrapper (halves input-tile HBM bytes for bf16 compute)
        x_p = jnp.zeros((b_p, in_p), cdt).at[:batch, :n_in].set(x.astype(cdt))

        if self.use_fused:
            flat = [p for lp in layer_params for p in lp]
            out_p = _fused_forward(x_p, flat, cfgs, cdt, tm, self.output_dtype,
                                   self._vmem_limit)
        else:
            h = x_p
            n = len(cfgs)
            for li, (lp, cfg) in enumerate(zip(layer_params, cfgs)):
                od = self.output_dtype if li == n - 1 else cdt   # bf16 inter-layer traffic
                h = _tiled_layer_forward(h, lp, cfg, cdt, tm, od, self._vmem_limit)
            out_p = h

        return out_p[:batch, :self.num_outputs]

    def __call__(self, x):
        return self._forward(x, self.layer_params)


# ------------------------------------ reference ------------------------------------

def _reference(ff: FeedForwardPallas, x, compute_dtype=jnp.float32):
    """Pure-JAX reference mirroring the PyTorch module (matmul in compute_dtype, f32 acc)."""
    h = x
    n = len(ff.ref_params)
    for idx, (w, b, gamma, beta) in enumerate(ff.ref_params):
        is_last = idx == n - 1
        h = jnp.dot(h.astype(compute_dtype), w.T.astype(compute_dtype),
                    preferred_element_type=jnp.float32) + b
        if (not is_last) and ff.layer_norm:
            mean = jnp.mean(h, axis=-1, keepdims=True)
            var = jnp.mean((h - mean) ** 2, axis=-1, keepdims=True)
            h = (h - mean) * lax.rsqrt(var + 1e-5) * gamma + beta
        act = ff.activation_last if is_last else ff.activation
        h = _apply_activation(h, act)
    return h


if __name__ == "__main__":
    key = jax.random.PRNGKey(0)
    key, kx1, kp1, kx2, kp2 = jax.random.split(key, 5)

    # --- Test 1: small config, fused path, f32 compute (tight check vs PyTorch math) ---
    ff32 = FeedForwardPallas(num_inputs=16, num_outputs=8, num_hidden=32, num_layers=3,
                             dropout=0.1, activation="relu", activation_last=None,
                             dropout_last=False, layer_norm=True, key=kp1,
                             compute_dtype=jnp.float32)
    x1 = jax.random.normal(kx1, (8, 16), jnp.float32)
    out1 = jax.block_until_ready(ff32(x1))
    ref1 = _reference(ff32, x1, jnp.float32)
    assert out1.shape == (8, 8), out1.shape
    assert jnp.allclose(out1, ref1, atol=1e-4, rtol=1e-4), \
        float(jnp.max(jnp.abs(out1 - ref1)))

    # --- Test 2: same shapes, fused path, bf16 matmul (default perf config) ---
    ffbf = FeedForwardPallas(num_inputs=16, num_outputs=8, num_hidden=32, num_layers=3,
                             dropout=0.1, activation="tanh", activation_last="sigmoid",
                             dropout_last=False, layer_norm=True, key=kp1,
                             compute_dtype=jnp.bfloat16)
    out2 = jax.block_until_ready(ffbf(x1))
    ref2_bf = _reference(ffbf, x1, jnp.bfloat16)   # same math as kernel
    ref2_f32 = _reference(ffbf, x1, jnp.float32)   # PyTorch-exact math
    assert jnp.allclose(out2, ref2_bf, atol=2e-3, rtol=2e-3), \
        float(jnp.max(jnp.abs(out2 - ref2_bf)))
    assert jnp.allclose(out2, ref2_f32, atol=5e-2, rtol=5e-2), \
        float(jnp.max(jnp.abs(out2 - ref2_f32)))

    # --- Test 3: tiled fallback path (forced), padding + K-accumulation exercised, f32 ---
    fft = FeedForwardPallas(num_inputs=300, num_outputs=40, num_hidden=200, num_layers=3,
                            dropout=0.0, activation="relu", activation_last=None,
                            dropout_last=False, layer_norm=True, key=kp2,
                            compute_dtype=jnp.float32, force_tiled=True)
    x3 = jax.random.normal(kx2, (10, 300), jnp.float32)
    out3 = jax.block_until_ready(fft(x3))
    ref3 = _reference(fft, x3, jnp.float32)
    assert out3.shape == (10, 40), out3.shape
    assert jnp.allclose(out3, ref3, atol=1e-4, rtol=1e-4), \
        float(jnp.max(jnp.abs(out3 - ref3)))

    # --- Test 4: tiled fallback with bf16 compute + bf16 inter-layer activations ---
    fft_bf = FeedForwardPallas(num_inputs=300, num_outputs=40, num_hidden=200, num_layers=3,
                               dropout=0.0, activation="relu", activation_last=None,
                               dropout_last=False, layer_norm=True, key=kp2,
                               compute_dtype=jnp.bfloat16, force_tiled=True)
    out4 = jax.block_until_ready(fft_bf(x3))
    ref4_bf = _reference(fft_bf, x3, jnp.bfloat16)
    ref4_f32 = _reference(fft_bf, x3, jnp.float32)
    assert out4.shape == (10, 40), out4.shape
    assert jnp.allclose(out4, ref4_bf, atol=1e-2, rtol=1e-2), \
        float(jnp.max(jnp.abs(out4 - ref4_bf)))
    assert jnp.allclose(out4, ref4_f32, atol=6e-2, rtol=6e-2), \
        float(jnp.max(jnp.abs(out4 - ref4_f32)))

    print("KERNEL_OK")
</pallas_src>

<mosaic_0001>
module attributes {stable_mosaic.version = 11 : i64} {
  func.func @kernel(%arg0: i32, %arg1: memref<8x128xf32, #tpu.memory_space<vmem>>, %arg2: memref<128x128xf32, #tpu.memory_space<vmem>>, %arg3: memref<1x128xf32, #tpu.memory_space<vmem>>, %arg4: memref<1x128xf32, #tpu.memory_space<vmem>>, %arg5: memref<1x128xf32, #tpu.memory_space<vmem>>, %arg6: memref<128x128xf32, #tpu.memory_space<vmem>>, %arg7: memref<1x128xf32, #tpu.memory_space<vmem>>, %arg8: memref<1x128xf32, #tpu.memory_space<vmem>>, %arg9: memref<1x128xf32, #tpu.memory_space<vmem>>, %arg10: memref<128x128xf32, #tpu.memory_space<vmem>>, %arg11: memref<1x128xf32, #tpu.memory_space<vmem>>, %arg12: memref<8x128xf32, #tpu.memory_space<vmem>>) attributes {dimension_semantics = [#tpu.dimension_semantics<parallel>], iteration_bounds = array<i64: 1>, scalar_prefetch = 0 : i64, scratch_operands = 0 : i64, tpu.core_type = #tpu.core_type<tc>, window_params = [{transform_indices = @transform_0, window_bounds = array<i64: 8, 128>}, {pipeline_mode = #tpu.pipeline_mode<synchronous>, transform_indices = @transform_1, window_bounds = array<i64: 128, 128>}, {pipeline_mode = #tpu.pipeline_mode<synchronous>, transform_indices = @transform_2, window_bounds = array<i64: 1, 128>}, {pipeline_mode = #tpu.pipeline_mode<synchronous>, transform_indices = @transform_3, window_bounds = array<i64: 1, 128>}, {pipeline_mode = #tpu.pipeline_mode<synchronous>, transform_indices = @transform_4, window_bounds = array<i64: 1, 128>}, {pipeline_mode = #tpu.pipeline_mode<synchronous>, transform_indices = @transform_5, window_bounds = array<i64: 128, 128>}, {pipeline_mode = #tpu.pipeline_mode<synchronous>, transform_indices = @transform_6, window_bounds = array<i64: 1, 128>}, {pipeline_mode = #tpu.pipeline_mode<synchronous>, transform_indices = @transform_7, window_bounds = array<i64: 1, 128>}, {pipeline_mode = #tpu.pipeline_mode<synchronous>, transform_indices = @transform_8, window_bounds = array<i64: 1, 128>}, {pipeline_mode = #tpu.pipeline_mode<synchronous>, transform_indices = @transform_9, window_bounds = array<i64: 128, 128>}, {pipeline_mode = #tpu.pipeline_mode<synchronous>, transform_indices = @transform_10, window_bounds = array<i64: 1, 128>}, {transform_indices = @transform_11, window_bounds = array<i64: 8, 128>}]} {
    %c0 = arith.constant 0 : index
    %c0_0 = arith.constant 0 : index
    %0 = vector.load %arg1[%c0, %c0_0] : memref<8x128xf32, #tpu.memory_space<vmem>>, vector<8x128xf32>
    %c0_1 = arith.constant 0 : index
    %c0_2 = arith.constant 0 : index
    %1 = vector.load %arg4[%c0_1, %c0_2] : memref<1x128xf32, #tpu.memory_space<vmem>>, vector<1x128xf32>
    %c0_3 = arith.constant 0 : index
    %c0_4 = arith.constant 0 : index
    %2 = vector.load %arg5[%c0_3, %c0_4] : memref<1x128xf32, #tpu.memory_space<vmem>>, vector<1x128xf32>
    %c0_5 = arith.constant 0 : index
    %c0_6 = arith.constant 0 : index
    %3 = vector.load %arg2[%c0_5, %c0_6] : memref<128x128xf32, #tpu.memory_space<vmem>>, vector<128x128xf32>
    %cst = arith.constant dense<0.000000e+00> : vector<8x128xf32>
    %4 = tpu.matmul %0, %3, %cst {dimension_numbers = #tpu.dot_dimension_numbers<[1], [0], [0], [1], [0, 0, 1, 1], [], []>} : vector<8x128xf32>, vector<128x128xf32>, vector<8x128xf32> -> vector<8x128xf32>
    %c0_7 = arith.constant 0 : index
    %c0_8 = arith.constant 0 : index
    %5 = vector.load %arg3[%c0_7, %c0_8] : memref<1x128xf32, #tpu.memory_space<vmem>>, vector<1x128xf32>
    %6 = vector.broadcast %5 : vector<1x128xf32> to vector<8x128xf32>
    %7 = arith.addf %4, %6 : vector<8x128xf32>
    %cst_9 = arith.constant dense<0.000000e+00> : vector<8xf32>
    %8 = vector.multi_reduction <add>, %7, %cst_9 [1] : vector<8x128xf32> to vector<8xf32>
    %9 = vector.shape_cast %8 : vector<8xf32> to vector<8x1xf32>
    %cst_10 = arith.constant 3.125000e-02 : f32
    %10 = vector.broadcast %cst_10 : f32 to vector<8x1xf32>
    %11 = arith.mulf %9, %10 : vector<8x1xf32>
    %12 = vector.broadcast %11 : vector<8x1xf32> to vector<8x128xf32>
    %13 = arith.subf %7, %12 : vector<8x128xf32>
    %14 = tpu.iota {dimensions = array<i32: 1>} : vector<8x128xi32>
    %c32_i32 = arith.constant 32 : i32
    %15 = vector.broadcast %c32_i32 : i32 to vector<8x128xi32>
    %16 = arith.cmpi slt, %14, %15 : vector<8x128xi32>
    %cst_11 = arith.constant 0.000000e+00 : f32
    %17 = vector.broadcast %cst_11 : f32 to vector<8x128xf32>
    %18 = arith.select %16, %13, %17 : vector<8x128xi1>, vector<8x128xf32>
    %19 = arith.mulf %18, %18 : vector<8x128xf32>
    %cst_12 = arith.constant dense<0.000000e+00> : vector<8xf32>
    %20 = vector.multi_reduction <add>, %19, %cst_12 [1] : vector<8x128xf32> to vector<8xf32>
    %21 = vector.shape_cast %20 : vector<8xf32> to vector<8x1xf32>
    %cst_13 = arith.constant 3.125000e-02 : f32
    %22 = vector.broadcast %cst_13 : f32 to vector<8x1xf32>
    %23 = arith.mulf %21, %22 : vector<8x1xf32>
    %cst_14 = arith.constant 9.99999974E-6 : f32
    %24 = vector.broadcast %cst_14 : f32 to vector<8x1xf32>
    %25 = arith.addf %23, %24 : vector<8x1xf32>
    %26 = math.rsqrt %25 : vector<8x1xf32>
    %27 = vector.broadcast %26 : vector<8x1xf32> to vector<8x128xf32>
    %28 = arith.mulf %18, %27 : vector<8x128xf32>
    %29 = vector.broadcast %1 : vector<1x128xf32> to vector<8x128xf32>
    %30 = arith.mulf %28, %29 : vector<8x128xf32>
    %31 = vector.broadcast %2 : vector<1x128xf32> to vector<8x128xf32>
    %32 = arith.addf %30, %31 : vector<8x128xf32>
    %cst_15 = arith.constant 0.000000e+00 : f32
    %33 = vector.broadcast %cst_15 : f32 to vector<8x128xf32>
    %34 = arith.maximumf %32, %33 : vector<8x128xf32>
    %c0_16 = arith.constant 0 : index
    %c0_17 = arith.constant 0 : index
    %35 = vector.load %arg8[%c0_16, %c0_17] : memref<1x128xf32, #tpu.memory_space<vmem>>, vector<1x128xf32>
    %c0_18 = arith.constant 0 : index
    %c0_19 = arith.constant 0 : index
    %36 = vector.load %arg9[%c0_18, %c0_19] : memref<1x128xf32, #tpu.memory_space<vmem>>, vector<1x128xf32>
    %c0_20 = arith.constant 0 : index
    %c0_21 = arith.constant 0 : index
    %37 = vector.load %arg6[%c0_20, %c0_21] : memref<128x128xf32, #tpu.memory_space<vmem>>, vector<128x128xf32>
    %cst_22 = arith.constant dense<0.000000e+00> : vector<8x128xf32>
    %38 = tpu.matmul %34, %37, %cst_22 {dimension_numbers = #tpu.dot_dimension_numbers<[1], [0], [0], [1], [0, 0, 1, 1], [], []>} : vector<8x128xf32>, vector<128x128xf32>, vector<8x128xf32> -> vector<8x128xf32>
    %c0_23 = arith.constant 0 : index
    %c0_24 = arith.constant 0 : index
    %39 = vector.load %arg7[%c0_23, %c0_24] : memref<1x128xf32, #tpu.memory_space<vmem>>, vector<1x128xf32>
    %40 = vector.broadcast %39 : vector<1x128xf32> to vector<8x128xf32>
    %41 = arith.addf %38, %40 : vector<8x128xf32>
    %cst_25 = arith.constant dense<0.000000e+00> : vector<8xf32>
    %42 = vector.multi_reduction <add>, %41, %cst_25 [1] : vector<8x128xf32> to vector<8xf32>
    %43 = vector.shape_cast %42 : vector<8xf32> to vector<8x1xf32>
    %cst_26 = arith.constant 3.125000e-02 : f32
    %44 = vector.broadcast %cst_26 : f32 to vector<8x1xf32>
    %45 = arith.mulf %43, %44 : vector<8x1xf32>
    %46 = vector.broadcast %45 : vector<8x1xf32> to vector<8x128xf32>
    %47 = arith.subf %41, %46 : vector<8x128xf32>
    %48 = tpu.iota {dimensions = array<i32: 1>} : vector<8x128xi32>
    %c32_i32_27 = arith.constant 32 : i32
    %49 = vector.broadcast %c32_i32_27 : i32 to vector<8x128xi32>
    %50 = arith.cmpi slt, %48, %49 : vector<8x128xi32>
    %cst_28 = arith.constant 0.000000e+00 : f32
    %51 = vector.broadcast %cst_28 : f32 to vector<8x128xf32>
    %52 = arith.select %50, %47, %51 : vector<8x128xi1>, vector<8x128xf32>
    %53 = arith.mulf %52, %52 : vector<8x128xf32>
    %cst_29 = arith.constant dense<0.000000e+00> : vector<8xf32>
    %54 = vector.multi_reduction <add>, %53, %cst_29 [1] : vector<8x128xf32> to vector<8xf32>
    %55 = vector.shape_cast %54 : vector<8xf32> to vector<8x1xf32>
    %cst_30 = arith.constant 3.125000e-02 : f32
    %56 = vector.broadcast %cst_30 : f32 to vector<8x1xf32>
    %57 = arith.mulf %55, %56 : vector<8x1xf32>
    %cst_31 = arith.constant 9.99999974E-6 : f32
    %58 = vector.broadcast %cst_31 : f32 to vector<8x1xf32>
    %59 = arith.addf %57, %58 : vector<8x1xf32>
    %60 = math.rsqrt %59 : vector<8x1xf32>
    %61 = vector.broadcast %60 : vector<8x1xf32> to vector<8x128xf32>
    %62 = arith.mulf %52, %61 : vector<8x128xf32>
    %63 = vector.broadcast %35 : vector<1x128xf32> to vector<8x128xf32>
    %64 = arith.mulf %62, %63 : vector<8x128xf32>
    %65 = vector.broadcast %36 : vector<1x128xf32> to vector<8x128xf32>
    %66 = arith.addf %64, %65 : vector<8x128xf32>
    %cst_32 = arith.constant 0.000000e+00 : f32
    %67 = vector.broadcast %cst_32 : f32 to vector<8x128xf32>
    %68 = arith.maximumf %66, %67 : vector<8x128xf32>
    %c0_33 = arith.constant 0 : index
    %c0_34 = arith.constant 0 : index
    %69 = vector.load %arg10[%c0_33, %c0_34] : memref<128x128xf32, #tpu.memory_space<vmem>>, vector<128x128xf32>
    %cst_35 = arith.constant dense<0.000000e+00> : vector<8x128xf32>
    %70 = tpu.matmul %68, %69, %cst_35 {dimension_numbers = #tpu.dot_dimension_numbers<[1], [0], [0], [1], [0, 0, 1, 1], [], []>} : vector<8x128xf32>, vector<128x128xf32>, vector<8x128xf32> -> vector<8x128xf32>
    %c0_36 = arith.constant 0 : index
    %c0_37 = arith.constant 0 : index
    %71 = vector.load %arg11[%c0_36, %c0_37] : memref<1x128xf32, #tpu.memory_space<vmem>>, vector<1x128xf32>
    %72 = vector.broadcast %71 : vector<1x128xf32> to vector<8x128xf32>
    %73 = arith.addf %70, %72 : vector<8x128xf32>
    %c0_38 = arith.constant 0 : index
    %c0_39 = arith.constant 0 : index
    %74 = vector.load %arg12[%c0_38, %c0_39] : memref<8x128xf32, #tpu.memory_space<vmem>>, vector<8x128xf32>
    tpu.vector_store %arg12[%c0_38, %c0_39], %73 {strides = array<i32>} : memref<8x128xf32, #tpu.memory_space<vmem>>, vector<8x128xf32>,
    return
  }
  func.func @transform_0(%arg0: i32) -> (i32, i32) {
    %c0_i32 = arith.constant 0 : i32
    %c0_i32_0 = arith.constant 0 : i32
    return %arg0, %c0_i32 : i32, i32
  }
  func.func @transform_1(%arg0: i32) -> (i32, i32) {
    %c0_i32 = arith.constant 0 : i32
    %c0_i32_0 = arith.constant 0 : i32
    %c0_i32_1 = arith.constant 0 : i32
    return %c0_i32, %c0_i32_0 : i32, i32
  }
  func.func @transform_2(%arg0: i32) -> (i32, i32) {
    %c0_i32 = arith.constant 0 : i32
    %c0_i32_0 = arith.constant 0 : i32
    %c0_i32_1 = arith.constant 0 : i32
    return %c0_i32, %c0_i32_0 : i32, i32
  }
  func.func @transform_3(%arg0: i32) -> (i32, i32) {
    %c0_i32 = arith.constant 0 : i32
    %c0_i32_0 = arith.constant 0 : i32
    %c0_i32_1 = arith.constant 0 : i32
    return %c0_i32, %c0_i32_0 : i32, i32
  }
  func.func @transform_4(%arg0: i32) -> (i32, i32) {
    %c0_i32 = arith.constant 0 : i32
    %c0_i32_0 = arith.constant 0 : i32
    %c0_i32_1 = arith.constant 0 : i32
    return %c0_i32, %c0_i32_0 : i32, i32
  }
  func.func @transform_5(%arg0: i32) -> (i32, i32) {
    %c0_i32 = arith.constant 0 : i32
    %c0_i32_0 = arith.constant 0 : i32
    %c0_i32_1 = arith.constant 0 : i32
    return %c0_i32, %c0_i32_0 : i32, i32
  }
  func.func @transform_6(%arg0: i32) -> (i32, i32) {
    %c0_i32 = arith.constant 0 : i32
    %c0_i32_0 = arith.constant 0 : i32
    %c0_i32_1 = arith.constant 0 : i32
    return %c0_i32, %c0_i32_0 : i32, i32
  }
  func.func @transform_7(%arg0: i32) -> (i32, i32) {
    %c0_i32 = arith.constant 0 : i32
    %c0_i32_0 = arith.constant 0 : i32
    %c0_i32_1 = arith.constant 0 : i32
    return %c0_i32, %c0_i32_0 : i32, i32
  }
  func.func @transform_8(%arg0: i32) -> (i32, i32) {
    %c0_i32 = arith.constant 0 : i32
    %c0_i32_0 = arith.constant 0 : i32
    %c0_i32_1 = arith.constant 0 : i32
    return %c0_i32, %c0_i32_0 : i32, i32
  }
  func.func @transform_9(%arg0: i32) -> (i32, i32) {
    %c0_i32 = arith.constant 0 : i32
    %c0_i32_0 = arith.constant 0 : i32
    %c0_i32_1 = arith.constant 0 : i32
    return %c0_i32, %c0_i32_0 : i32, i32
  }
  func.func @transform_10(%arg0: i32) -> (i32, i32) {
    %c0_i32 = arith.constant 0 : i32
    %c0_i32_0 = arith.constant 0 : i32
    %c0_i32_1 = arith.constant 0 : i32
    return %c0_i32, %c0_i32_0 : i32, i32
  }
  func.func @transform_11(%arg0: i32) -> (i32, i32) {
    %c0_i32 = arith.constant 0 : i32
    %c0_i32_0 = arith.constant 0 : i32
    return %arg0, %c0_i32 : i32, i32
  }
}

</mosaic_0001>

<bundles_post_ra>
// kernel: _forward_impl.1
= control target key start
LH: loop header
LB: loop body
LE: loop exit
PB: predicated region body
PF: predicated region fallthrough
CT: control target
= control target key end

     0   :  { %16 = vsyncpa [#allocation3], 0  ;;  %s864_s0 = inlined_call_operand.vmem [shape: f32[8,128], index: 0, kind: input, shape index: {}]   ;;  %s865_s1 = inlined_call_operand.hbm [shape: f32[128,128], index: 1, kind: input, shape index: {}]   ;;  %s866_s2 = inlined_call_operand.vmem [shape: f32[1,128], index: 2, kind: input, shape index: {}]   ;;  %s867_s3 = inlined_call_operand.vmem [shape: f32[1,128], index: 3, kind: input, shape index: {}]   ;;  %s868_s4 = inlined_call_operand.vmem [shape: f32[1,128], index: 4, kind: input, shape index: {}]   ;;  %s869_s5 = inlined_call_operand.hbm [shape: f32[128,128], index: 5, kind: input, shape index: {}]   ;;  %s870_s6 = inlined_call_operand.vmem [shape: f32[1,128], index: 6, kind: input, shape index: {}]   ;;  %s871_s7 = inlined_call_operand.vmem [shape: f32[1,128], index: 7, kind: input, shape index: {}]   ;;  %s872_s8 = inlined_call_operand.vmem [shape: f32[1,128], index: 8, kind: input, shape index: {}]   ;;  %s873_s9 = inlined_call_operand.hbm [shape: f32[128,128], index: 9, kind: input, shape index: {}]   ;;  %s874_s10 = inlined_call_operand.vmem [shape: f32[1,128], index: 10, kind: input, shape index: {}]   ;;  %s875_s11 = inlined_call_operand.hbm [shape: f32[8,128], index: 11, kind: output, shape index: {}]  }
   0x1   :  { %17 = vsyncpa [#allocation6], 0 }
   0x2   :  { %18 = vsyncpa [#allocation4], 0  ;;  %s699_s17 = smov [#allocation5]   ;;  %s700_s19 = smov [#allocation2]  }
   0x3   :  { %s44_s18 = sshll.u32 %s699_s17, 4  ;;  %s26_s20 = sshll.u32 %s700_s19, 4  ;;  %s45_s18 = int_to_ptr.vmem [resolvable:$true] %s44_s18  ;;  %s27_s20 = int_to_ptr.vmem [resolvable:$true] %s26_s20 }
   0x4   :  { %s621_s21 = scalar_lea.vmem %s45_s18, 2048  ;;  %p626_p1 = scmp.lt.s32.totalorder %s45_s18, %s45_s18 }
   0x5   :  { %p622_p0 = scmp.ne.s32.totalorder %s45_s18, %s621_s21  ;;  %p627_p2 = scmp.lt.s32.totalorder %s621_s21, %s621_s21 }
   0x7   :  { %p628_p3 = por %p627_p2, %p626_p1 }
   0x9   :  { %p629_p4 = pnand %p628_p3, %p622_p0 }
   0xb   :  { %632 = shalt.err (!%p629_p4)
}
   0xc   :  { %s701_s22 = smov 128   ;;  %s702_s23 = smov 8  }
   0xd   :  { %50 = dma.hbm_to_vmem [thread:$0]  %s869_s5, 2048, %s45_s18, [#allocation6], %s701_s22, %s701_s22, %s702_s23  }
   0xe   :  { %s641_s26 = scalar_lea.vmem %s27_s20, 2048  ;;  %p646_p6 = scmp.lt.s32.totalorder %s27_s20, %s27_s20 }
   0xf   :  { %p642_p5 = scmp.ne.s32.totalorder %s27_s20, %s641_s26  ;;  %p647_p7 = scmp.lt.s32.totalorder %s641_s26, %s641_s26 }
  0x11   :  { %p648_p8 = por %p647_p7, %p646_p6 }
  0x13   :  { %p649_p9 = pnand %p648_p8, %p642_p5 }
  0x15   :  { %652 = shalt.err (!%p649_p9)
}
  0x16   :  { %32 = dma.hbm_to_vmem [thread:$0]  %s865_s1, 2048, %s27_s20, [#allocation3], %s701_s22, %s701_s22, %s702_s23  }
  0x17   :  { %s703_s29 = smov [#allocation7]  }
  0x18   :  { %s62_s30 = sshll.u32 %s703_s29, 4  ;;  %s63_s30 = int_to_ptr.vmem [resolvable:$true] %s62_s30 }
  0x19   :  { %s661_s12 = scalar_lea.vmem %s63_s30, 2048  ;;  %p666_p11 = scmp.lt.s32.totalorder %s63_s30, %s63_s30 }
  0x1a   :  { %p662_p10 = scmp.ne.s32.totalorder %s63_s30, %s661_s12  ;;  %p667_p12 = scmp.lt.s32.totalorder %s661_s12, %s661_s12 }
  0x1c   :  { %p668_p13 = por %p667_p12, %p666_p11 }
  0x1e   :  { %p669_p0 = pnand %p668_p13, %p662_p10 }
  0x20   :  { %672 = shalt.err (!%p669_p0)
}
  0x21   :  { %68 = dma.hbm_to_vmem [thread:$0]  %s873_s9, 2048, %s63_s30, [#allocation6], %s701_s22, %s701_s22, %s702_s23  }
  0x22   :  { %693 = dma.done.wait [#allocation3], 2048  }
  0x23   :  { %694 = vsyncadd [#allocation3], 4294965248 }
  0x24   :  { %695 = dma.done.wait [#allocation6], 4096  }
  0x25   :  { %696 = vsyncadd [#allocation6], 4294963200  ;;  %v704_v0 = vmov 0.0   ;;  %vm705_vm0 = vmmov 0   ;;  %v98_v1 = vld [vmem:[#allocation2 + $0x78] sm:$0xff]  ;;  %v97_v2 = vld [vmem:[#allocation2 + $0x70] sm:$0xff]  ;;  %v180_v25 = vlaneseq }
  0x26   :  { %496 = vmatprep.subr.mxu0 %v704_v0  ;;  %528 = vmatprep.mubr.msk.f32.mxu0 %vm705_vm0, %v704_v0  ;;  %v96_v3 = vld [vmem:[#allocation2 + $0x68] sm:$0xff]  ;;  %v95_v4 = vld [vmem:[#allocation2 + $0x60] sm:$0xff]  ;;  %v94_v5 = vld [vmem:[#allocation2 + $0x58] sm:$0xff]  ;;  %s706_s23 = smov [#allocation8]  }
  0x27   :  { %531 = vmatprep.subr.mxu1 %v704_v0  ;;  %563 = vmatprep.mubr.msk.f32.mxu1 %vm705_vm0, %v704_v0  ;;  %v93_v6 = vld [vmem:[#allocation2 + $0x50] sm:$0xff]  ;;  %v92_v7 = vld [vmem:[#allocation2 + $0x48] sm:$0xff]  ;;  %v91_v8 = vld [vmem:[#allocation2 + $0x40] sm:$0xff]  ;;  %v809_v26 = vand.u32 127, %v180_v25  ;;  %s428_s24 = sshll.u32 %s706_s23, 4  ;;  %s429_s24 = int_to_ptr.vmem [resolvable:$true] %s428_s24 }
  0x28   :  { %497 = vmatpush3.msra.mxu0 %v98_v1  ;;  %v90_v9 = vld [vmem:[#allocation2 + $0x38] sm:$0xff]  ;;  %v89_v10 = vld [vmem:[#allocation2 + $0x30] sm:$0xff]  ;;  %v88_v11 = vld [vmem:[#allocation2 + $0x28] sm:$0xff]  ;;  %p678_p2 = scmp.lt.s32.totalorder %s429_s24, %s429_s24 }
  0x29   :  { %498 = vmatprep.subr.mxu0 %v704_v0  ;;  %v87_v12 = vld [vmem:[#allocation2 + $0x20] sm:$0xff]  ;;  %v86_v13 = vld [vmem:[#allocation2 + $0x18] sm:$0xff]  ;;  %v85_v14 = vld [vmem:[#allocation2 + $0x10] sm:$0xff]  ;;  %vm182_vm1 = vcmp.lt.s32.totalorder %v809_v26, 32 }
  0x2a   :  { %499 = vmatpush3.msra.mxu0 %v97_v2  ;;  %v84_v15 = vld [vmem:[#allocation2 + $0x8] sm:$0xff]  ;;  %v83_v16 = vld [vmem:[#allocation2] sm:$0xff]  ;;  %v223_v22 = vld [vmem:[#allocation5 + $0x78] sm:$0xff] }
  0x2b   :  { %500 = vmatprep.subr.mxu0 %v704_v0  ;;  %v80_v17 = vld [vmem:[%s864_s0] sm:$0xff]  ;;  %v222_v23 = vld [vmem:[#allocation5 + $0x70] sm:$0xff]  ;;  %532 = vmatpush3.msra.mxu1 %v223_v22  ;;  %v221_v24 = vld [vmem:[#allocation5 + $0x68] sm:$0xff] }
  0x2c   :  { %501 = vmatpush3.msra.mxu0 %v96_v3  ;;  %v438_v18 = vld [vmem:[%s866_s2] ss:$0 sm:$0xff]  ;;  %533 = vmatprep.subr.mxu1 %v704_v0  ;;  %v219_v33 = vld [vmem:[#allocation5 + $0x58] sm:$0xff]  ;;  %v218_v34 = vld [vmem:[#allocation5 + $0x50] sm:$0xff] }
  0x2d   :  { %502 = vmatprep.subr.mxu0 %v704_v0  ;;  %534 = vmatpush3.msra.mxu1 %v222_v23  ;;  %v220_v32 = vld [vmem:[#allocation5 + $0x60] sm:$0xff]  ;;  %v217_v35 = vld [vmem:[#allocation5 + $0x48] sm:$0xff]  ;;  %v215_v37 = vld [vmem:[#allocation5 + $0x38] sm:$0xff] }
  0x2e   :  { %503 = vmatpush3.msra.mxu0 %v95_v4  ;;  %535 = vmatprep.subr.mxu1 %v704_v0  ;;  %v216_v36 = vld [vmem:[#allocation5 + $0x40] sm:$0xff]  ;;  %v214_v38 = vld [vmem:[#allocation5 + $0x30] sm:$0xff]  ;;  %v213_v39 = vld [vmem:[#allocation5 + $0x28] sm:$0xff] }
  0x2f   :  { %504 = vmatprep.subr.mxu0 %v704_v0  ;;  %536 = vmatpush3.msra.mxu1 %v221_v24  ;;  %v212_v40 = vld [vmem:[#allocation5 + $0x20] sm:$0xff]  ;;  %v211_v41 = vld [vmem:[#allocation5 + $0x18] sm:$0xff]  ;;  %v210_v42 = vld [vmem:[#allocation5 + $0x10] sm:$0xff] }
  0x30   :  { %505 = vmatpush3.msra.mxu0 %v94_v5  ;;  %537 = vmatprep.subr.mxu1 %v704_v0  ;;  %v209_v43 = vld [vmem:[#allocation5 + $0x8] sm:$0xff]  ;;  %v208_v44 = vld [vmem:[#allocation5] sm:$0xff]  ;;  %v343_v59 = vld [vmem:[#allocation7 + $0x78] sm:$0xff] }
  0x31   :  { %506 = vmatprep.subr.mxu0 %v704_v0  ;;  %538 = vmatpush3.msra.mxu1 %v220_v32  ;;  %v439_v49 = vld [vmem:[%s867_s3] ss:$0 sm:$0xff]  ;;  %v342_v60 = vld [vmem:[#allocation7 + $0x70] sm:$0xff]  ;;  %v341_v61 = vld [vmem:[#allocation7 + $0x68] sm:$0xff] }
  0x32   :  { %507 = vmatpush3.msra.mxu0 %v93_v6  ;;  %539 = vmatprep.subr.mxu1 %v704_v0  ;;  %v440_v51 = vld [vmem:[%s868_s4] ss:$0 sm:$0xff]  ;;  %v339_v5 = vld [vmem:[#allocation7 + $0x58] sm:$0xff]  ;;  %v338_v6 = vld [vmem:[#allocation7 + $0x50] sm:$0xff] }
  0x33   :  { %508 = vmatprep.subr.mxu0 %v704_v0  ;;  %540 = vmatpush3.msra.mxu1 %v219_v33  ;;  %v441_v55 = vld [vmem:[%s870_s6] ss:$0 sm:$0xff] }
  0x34   :  { %509 = vmatpush3.msra.mxu0 %v92_v7  ;;  %541 = vmatprep.subr.mxu1 %v704_v0  ;;  %v340_v4 = vld [vmem:[#allocation7 + $0x60] sm:$0xff]  ;;  %v337_v7 = vld [vmem:[#allocation7 + $0x48] sm:$0xff] }
  0x35   :  { %510 = vmatprep.subr.mxu0 %v704_v0  ;;  %542 = vmatpush3.msra.mxu1 %v218_v34  ;;  %v443_v23 = vld [vmem:[%s872_s8] ss:$0 sm:$0xff] }
  0x36   :  { %511 = vmatpush3.msra.mxu0 %v91_v8  ;;  %543 = vmatprep.subr.mxu1 %v704_v0  ;;  %v336_v8 = vld [vmem:[#allocation7 + $0x40] sm:$0xff] }
  0x37   :  { %512 = vmatprep.subr.mxu0 %v704_v0  ;;  %544 = vmatpush3.msra.mxu1 %v217_v35 }
  0x38   :  { %513 = vmatpush3.msra.mxu0 %v90_v9  ;;  %545 = vmatprep.subr.mxu1 %v704_v0  ;;  %v335_v9 = vld [vmem:[#allocation7 + $0x38] sm:$0xff] }
  0x39   :  { %514 = vmatprep.subr.mxu0 %v704_v0  ;;  %546 = vmatpush3.msra.mxu1 %v216_v36 }
  0x3a   :  { %515 = vmatpush3.msra.mxu0 %v89_v10  ;;  %547 = vmatprep.subr.mxu1 %v704_v0  ;;  %v334_v10 = vld [vmem:[#allocation7 + $0x30] sm:$0xff] }
  0x3b   :  { %516 = vmatprep.subr.mxu0 %v704_v0  ;;  %548 = vmatpush3.msra.mxu1 %v215_v37 }
  0x3c   :  { %517 = vmatpush3.msra.mxu0 %v88_v11  ;;  %549 = vmatprep.subr.mxu1 %v704_v0  ;;  %v333_v11 = vld [vmem:[#allocation7 + $0x28] sm:$0xff] }
  0x3d   :  { %518 = vmatprep.subr.mxu0 %v704_v0  ;;  %550 = vmatpush3.msra.mxu1 %v214_v38 }
  0x3e   :  { %519 = vmatpush3.msra.mxu0 %v87_v12  ;;  %551 = vmatprep.subr.mxu1 %v704_v0  ;;  %v332_v12 = vld [vmem:[#allocation7 + $0x20] sm:$0xff] }
  0x3f   :  { %520 = vmatprep.subr.mxu0 %v704_v0  ;;  %552 = vmatpush3.msra.mxu1 %v213_v39 }
  0x40   :  { %521 = vmatpush3.msra.mxu0 %v86_v13  ;;  %553 = vmatprep.subr.mxu1 %v704_v0  ;;  %v331_v13 = vld [vmem:[#allocation7 + $0x18] sm:$0xff] }
  0x41   :  { %522 = vmatprep.subr.mxu0 %v704_v0  ;;  %554 = vmatpush3.msra.mxu1 %v212_v40 }
  0x42   :  { %523 = vmatpush3.msra.mxu0 %v85_v14  ;;  %555 = vmatprep.subr.mxu1 %v704_v0  ;;  %v330_v14 = vld [vmem:[#allocation7 + $0x10] sm:$0xff] }
  0x43   :  { %524 = vmatprep.subr.mxu0 %v704_v0  ;;  %556 = vmatpush3.msra.mxu1 %v211_v41 }
  0x44   :  { %525 = vmatpush3.msra.mxu0 %v84_v15  ;;  %557 = vmatprep.subr.mxu1 %v704_v0  ;;  %v329_v15 = vld [vmem:[#allocation7 + $0x8] sm:$0xff] }
  0x45   :  { %526 = vmatprep.subr.mxu0 %v704_v0  ;;  %558 = vmatpush3.msra.mxu1 %v210_v42 }
  0x46   :  { %527 = vmatpush3.msra.mxu0 %v83_v16  ;;  %559 = vmatprep.subr.mxu1 %v704_v0  ;;  %v328_v16 = vld [vmem:[#allocation7] sm:$0xff] }
  0x47   :  { %529 = vmatmul.mubr.f32.vlgmr.msra.gmra.mxu0 %v80_v17  ;;  %566 = vmatprep.subr.mxu0 %v704_v0 }
  0x48   :  { %598 = vmatprep.mubr.msk.f32.mxu0 %vm705_vm0, %v704_v0  ;;  %560 = vmatpush3.msra.mxu1 %v209_v43 }
  0x49   :  { %561 = vmatprep.subr.mxu1 %v704_v0  ;;  %567 = vmatpush3.msra.mxu0 %v343_v59 }
  0x4a   :  { %562 = vmatpush3.msra.mxu1 %v208_v44  ;;  %568 = vmatprep.subr.mxu0 %v704_v0 }
  0x4b   :  { %569 = vmatpush3.msra.mxu0 %v342_v60 }
  0x4c   :  { %570 = vmatprep.subr.mxu0 %v704_v0 }
  0x4d   :  { %571 = vmatpush3.msra.mxu0 %v341_v61 }
  0x4e   :  { %572 = vmatprep.subr.mxu0 %v704_v0 }
  0x4f   :  { %573 = vmatpush3.msra.mxu0 %v340_v4 }
  0x50   :  { %574 = vmatprep.subr.mxu0 %v704_v0 }
  0x51   :  { %575 = vmatpush3.msra.mxu0 %v339_v5 }
  0x52   :  { %576 = vmatprep.subr.mxu0 %v704_v0 }
  0x53   :  { %577 = vmatpush3.msra.mxu0 %v338_v6 }
  0x54   :  { %578 = vmatprep.subr.mxu0 %v704_v0 }
  0x55   :  { %579 = vmatpush3.msra.mxu0 %v337_v7 }
  0x56   :  { %580 = vmatprep.subr.mxu0 %v704_v0 }
  0x57   :  { %581 = vmatpush3.msra.mxu0 %v336_v8 }
  0x58   :  { %582 = vmatprep.subr.mxu0 %v704_v0 }
  0x59   :  { %583 = vmatpush3.msra.mxu0 %v335_v9 }
  0x5a   :  { %584 = vmatprep.subr.mxu0 %v704_v0 }
  0x5b   :  { %585 = vmatpush3.msra.mxu0 %v334_v10 }
  0x5c   :  { %586 = vmatprep.subr.mxu0 %v704_v0 }
  0x5d   :  { %587 = vmatpush3.msra.mxu0 %v333_v11 }
  0x5e   :  { %588 = vmatprep.subr.mxu0 %v704_v0 }
  0x5f   :  { %589 = vmatpush3.msra.mxu0 %v332_v12 }
  0x60   :  { %590 = vmatprep.subr.mxu0 %v704_v0 }
  0x61   :  { %591 = vmatpush3.msra.mxu0 %v331_v13 }
  0x62   :  { %592 = vmatprep.subr.mxu0 %v704_v0 }
  0x63   :  { %593 = vmatpush3.msra.mxu0 %v330_v14 }
  0x64   :  { %594 = vmatprep.subr.mxu0 %v704_v0 }
  0x65   :  { %595 = vmatpush3.msra.mxu0 %v329_v15 }
  0x66   :  { %596 = vmatprep.subr.mxu0 %v704_v0  ;;  %v444_v0 = vld [vmem:[%s874_s10] ss:$0 sm:$0xff] }
  0x67   :  { %597 = vmatpush3.msra.mxu0 %v328_v16 }
 0x107   :  { %v172_v19 = vpop.f32.mrf.mxu0 }
 0x108   :  { %v173_v20 = vadd.f32 %v438_v18, %v172_v19 }
 0x109   :  { %v530_v21 = vpop.f32.mrf.mxu0 }
 0x10a   :  { %176 = vadd.xlane.f32.xlu0 %v173_v20  ;;  %v442_v21 = vld [vmem:[%s871_s7] ss:$0 sm:$0xff]  ;;  %s673_s7 = scalar_lea.vmem %s429_s24, 128 }
 0x10b   :  { %p674_p1 = scmp.ne.s32.totalorder %s429_s24, %s673_s7  ;;  %p679_p3 = scmp.lt.s32.totalorder %s673_s7, %s673_s7 }
 0x10d   :  { %p680_p4 = por %p679_p3, %p678_p2 }
 0x10f   :  { %p681_p5 = pnand %p680_p4, %p674_p1 }
 0x193   :  { %v177_v27 = vpop.xlane.xlu0 %176 }
 0x194   :  { %v178_v28 = vmul.f32 0.03125, %v177_v27 }
 0x196   :  { %v179_v29 = vsub.f32 %v173_v20, %v178_v28 }
 0x198   :  { %v183_v30 = vsel %vm182_vm1, %v179_v29, 0.0 }
 0x199   :  { %v184_v31 = vmul.f32 %v183_v30, %v183_v30 }
 0x19b   :  { %185 = vadd.xlane.f32.xlu0 %v184_v31 }
 0x224   :  { %v186_v45 = vpop.xlane.xlu0 %185 }
 0x225   :  { %v187_v46 = vmul.f32 0.03125, %v186_v45 }
 0x227   :  { %v188_v47 = vadd.f32 1e-05, %v187_v46 }
 0x229   :  { %609 = vrsqrt.f32 %v188_v47 }
 0x236   :  { %v610_v48 = vpop.eup %609 }
 0x237   :  { %v190_v50 = vmul.f32 %v610_v48, %v183_v30 }
 0x239   :  { %v197_v52 = vmul.f32 %v439_v49, %v190_v50 }
 0x23b   :  { %v204_v53 = vadd.f32 %v440_v51, %v197_v52 }
 0x23d   :  { %v205_v54 = vmax.f32 %v204_v53, 0.0 }
 0x23f   :  { %564 = vmatmul.mubr.f32.vlgmr.msra.gmra.mxu1 %v205_v54 }
 0x2ff   :  { %v297_v56 = vpop.f32.mrf.mxu1 }
 0x300   :  { %v298_v57 = vadd.f32 %v441_v55, %v297_v56 }
 0x301   :  { %v565_v58 = vpop.f32.mrf.mxu1 }
 0x302   :  { %301 = vadd.xlane.f32.xlu1 %v298_v57 }
 0x38b   :  { %v302_v62 = vpop.xlane.xlu1 %301 }
 0x38c   :  { %v303_v63 = vmul.f32 0.03125, %v302_v62 }
 0x38e   :  { %v304_v1 = vsub.f32 %v298_v57, %v303_v63 }
 0x390   :  { %v305_v2 = vsel %vm182_vm1, %v304_v1, 0.0 }
 0x391   :  { %v306_v3 = vmul.f32 %v305_v2, %v305_v2 }
 0x393   :  { %307 = vadd.xlane.f32.xlu1 %v306_v3 }
 0x41c   :  { %v308_v17 = vpop.xlane.xlu1 %307 }
 0x41d   :  { %v309_v18 = vmul.f32 0.03125, %v308_v17 }
 0x41f   :  { %v310_v19 = vadd.f32 1e-05, %v309_v18 }
 0x421   :  { %611 = vrsqrt.f32 %v310_v19 }
 0x42e   :  { %v612_v20 = vpop.eup %611 }
 0x42f   :  { %v312_v22 = vmul.f32 %v612_v20, %v305_v2 }
 0x431   :  { %v319_v24 = vmul.f32 %v442_v21, %v312_v22 }
 0x433   :  { %v326_v25 = vadd.f32 %v443_v23, %v319_v24 }
 0x435   :  { %v327_v26 = vmax.f32 %v326_v25, 0.0 }
 0x437   :  { %599 = vmatmul.mubr.f32.vlgmr.msra.gmra.mxu0 %v327_v26 }
 0x4f7   :  { %v417_v27 = vpop.f32.mrf.mxu0 }
 0x4f8   :  { %v418_v28 = vadd.f32 %v444_v0, %v417_v27 }
 0x4f9   :  { %v600_v29 = vpop.f32.mrf.mxu0 }
 0x4fa   :  { %421 = vst [vmem:[#allocation8] sm:$0xff] %v418_v28 }
 0x4fb   :  { %684 = shalt.err (!%p681_p5)
}
 0x4fc   :  { %431 = dma.vmem_to_hbm [thread:$0]  %s429_s24, 128, %s875_s11, [#allocation4]  }
 0x4fd   :  { %697 = dma.done.wait [#allocation4], 128  }
 0x4fe   :  { %698 = vsyncadd [#allocation4], 4294967168 }
 0x4ff   :  { %435 = vsyncpa [#allocation3], 1 }
 0x500   :  { %436 = vsyncpa [#allocation6], 1 }
 0x501   :  { %437 = vsyncpa [#allocation4], 1 }

</bundles_post_ra>
